<compile_context>
chip_gen: v7x
topology: tpu7x:2x2x1
jax: 0.10.0
libtpu: 0.0.40
codegen_flags: <defaults>
</compile_context>

<pallas_src>
import jax
import jax.numpy as jnp
from jax import lax
from jax.experimental import pallas as pl
from jax.experimental.pallas import tpu as pltpu


_LANE = 128
_SUBLANE = 8
_MAX_TD = 16384          # widest resident feature chunk (64 KiB per f32 row)


def _round_up(v, m):
    return ((v + m - 1) // m) * m


def _tpu_config():
    """(tensorcores_per_chip, vmem_limit_bytes, x_tile_budget_bytes, x_buffers)."""
    kind = ""
    try:
        kind = jax.devices()[0].device_kind.lower()
    except Exception:
        pass
    if "v7" in kind or "tpu7" in kind:
        # v7x: 2 TensorCores/chip, only 64 MiB VMEM per TC -> stay well under,
        # but triple-buffer the streamed input (per-tile DMA is short here).
        return 2, 48 * 1024 * 1024, 8 * 1024 * 1024, 3
    if "v6" in kind or "v5" in kind or "v4" in kind:
        # 1 TensorCore, 128 MiB physical VMEM -> larger tiles, deeper scoped limit.
        return 1, 100 * 1024 * 1024, 16 * 1024 * 1024, 2
    # Unknown device: conservative settings that are valid everywhere.
    return 1, 48 * 1024 * 1024, 8 * 1024 * 1024, 2


def _choose_tiles(B, D, tile_budget, n_cores, max_td):
    """Pick (tb, td): the biggest x tile within the VMEM budget, megacore-aware."""
    d_lanes = _round_up(D, _LANE)
    if d_lanes <= max_td:
        td = D                                   # whole feature dim resident per tile
        row_bytes = d_lanes * 4
    else:                                        # near-equal, 128-aligned feature chunks
        g_d = pl.cdiv(D, max_td)
        td = _round_up(pl.cdiv(D, g_d), _LANE)
        row_bytes = td * 4

    # Rows per x tile: fill the budget (no artificial 512-row cap), multiple of 128.
    cap = max(_LANE, (tile_budget // row_bytes) // _LANE * _LANE)

    g_b = pl.cdiv(B, cap)
    # v7x megacore: the batch axis is "parallel" -> keep a balanced (multiple of
    # n_cores) tile count whenever there is enough data to be worth splitting.
    if n_cores > 1 and B * d_lanes * 4 >= (4 << 20):
        g_b = _round_up(max(g_b, n_cores), n_cores)

    if g_b <= 1:
        tb = _round_up(B, _SUBLANE)              # single tile == full (padded) out dim
    else:
        tb = _round_up(pl.cdiv(B, g_b), _LANE)   # lane-aligned out blocks
    return tb, td


def _x_block_spec(block_shape, index_map, n_buf):
    """x input spec; optionally triple-buffered (v7x) to keep the DMA queue full."""
    if n_buf > 2 and hasattr(pl, "Buffered"):
        try:
            return pl.BlockSpec(block_shape, index_map,
                                pipeline_mode=pl.Buffered(n_buf))
        except Exception:
            pass
    return pl.BlockSpec(block_shape, index_map)


def _linear_kernel_full_d(x_ref, w_ref, b_ref, o_ref):
    """Whole feature dim resident: one MXU pass per batch tile.

    x_ref: (tb, D) f32 batch tile, w_ref: (1, D) f32 resident weight row,
    b_ref: (1, 1) f32 bias in SMEM, o_ref: (1, tb) f32 lane-dense output slab.
    """
    # o(1, tb) = w(1, D) . x(tb, D)^T  -- contract the minor dims.
    o_ref[...] = (
        lax.dot_general(
            w_ref[...], x_ref[...],
            dimension_numbers=(((1,), (1,)), ((), ())),
            preferred_element_type=jnp.float32,
        )
        + b_ref[0, 0]
    ).astype(o_ref.dtype)


def _make_tiled_d_kernel(td, d_true, g_d):
    """Fallback for very wide D: accumulate over feature chunks (grid axis 1).

    The D tail of the last chunk is masked in-kernel on BOTH x and w so that x
    never has to be padded (copied) along D in the wrapper and OOB garbage can
    never poison real outputs.
    """
    rem = d_true - (g_d - 1) * td            # valid columns in the last chunk (static)
    needs_mask = rem != td

    def kernel(x_ref, w_ref, b_ref, o_ref, acc_ref):
        k = pl.program_id(1)

        @pl.when(k == 0)
        def _():
            # Fold the bias into the accumulator init.
            acc_ref[...] = jnp.zeros_like(acc_ref) + b_ref[0, 0]

        def contract(xv, wv):
            return lax.dot_general(
                wv, xv,
                dimension_numbers=(((1,), (1,)), ((), ())),
                preferred_element_type=jnp.float32,
            )

        if needs_mask:
            @pl.when(k == g_d - 1)
            def _():
                col_x = lax.broadcasted_iota(jnp.int32, x_ref.shape, 1)
                col_w = lax.broadcasted_iota(jnp.int32, w_ref.shape, 1)
                xv = jnp.where(col_x < rem, x_ref[...], 0.0)
                wv = jnp.where(col_w < rem, w_ref[...], 0.0)
                acc_ref[...] += contract(xv, wv)

            @pl.when(k < g_d - 1)
            def _():
                acc_ref[...] += contract(x_ref[...], w_ref[...])
        else:
            acc_ref[...] += contract(x_ref[...], w_ref[...])

        @pl.when(k == g_d - 1)
        def _():
            o_ref[...] = acc_ref[...].astype(o_ref.dtype)

    return kernel


def linear_regressor_forward(x, weight, bias, *, max_td=_MAX_TD):
    """Pallas equivalent of `nn.Linear(D, 1)(x).squeeze(1)`.

    x:      (B, D) float32 TF-IDF rows
    weight: (1, D) float32 (PyTorch nn.Linear layout: (out_features, in_features))
    bias:   (1,)   float32
    returns (B,) float32
    """
    B, D = x.shape
    assert weight.shape == (1, D)
    n_cores, vmem_limit, tile_budget, n_buf = _tpu_config()
    tb, td = _choose_tiles(B, D, tile_budget, n_cores, max_td)

    g_b = pl.cdiv(B, tb)
    g_d = pl.cdiv(D, td)
    b_out = g_b * tb           # padded lane-dense output width; ragged cols sliced off

    b2d = bias.reshape(1, 1).astype(jnp.float32)

    # Advisory cost, from the shapes actually streamed (W is resident in the
    # full-D path but re-fetched per step in the tiled-D path).
    x_bytes = 4 * g_b * tb * g_d * td
    w_bytes = 4 * (td if g_d == 1 else g_b * g_d * td)
    cost = pl.CostEstimate(flops=2 * g_b * tb * g_d * td, transcendentals=0,
                           bytes_accessed=x_bytes + w_bytes + 4 * b_out)
    compiler_params = pltpu.CompilerParams(
        dimension_semantics=("parallel",) if g_d == 1 else ("parallel", "arbitrary"),
        vmem_limit_bytes=vmem_limit,
    )

    bias_spec = pl.BlockSpec(memory_space=pltpu.MemorySpace.SMEM)   # (1,1) scalar

    if g_d == 1:
        grid = (g_b,)
        in_specs = [
            _x_block_spec((tb, D), lambda i: (i, 0), n_buf),   # streamed x tile
            pl.BlockSpec((1, D), lambda i: (0, 0)),            # resident W row
            bias_spec,
        ]
        out_spec = pl.BlockSpec((1, tb), lambda i: (0, i))     # lane-dense out slab
        kernel = _linear_kernel_full_d
        scratch = []
    else:
        grid = (g_b, g_d)                                      # reduction axis last
        in_specs = [
            pl.BlockSpec((tb, td), lambda i, k: (i, k)),
            pl.BlockSpec((1, td), lambda i, k: (0, k)),
            bias_spec,
        ]
        out_spec = pl.BlockSpec((1, tb), lambda i, k: (0, i))
        kernel = _make_tiled_d_kernel(td, D, g_d)
        scratch = [pltpu.VMEM((1, tb), jnp.float32)]           # lane-dense accumulator

    out = pl.pallas_call(
        kernel,
        out_shape=jax.ShapeDtypeStruct((1, b_out), jnp.float32),
        grid_spec=pltpu.PrefetchScalarGridSpec(
            num_scalar_prefetch=0,
            grid=grid,
            in_specs=in_specs,
            out_specs=out_spec,
            scratch_shapes=scratch,
        ),
        compiler_params=compiler_params,
        cost_estimate=cost,
    )(x, weight, b2d)

    return out[0, :B]   # drop ragged-tile columns; == .squeeze(1)


if __name__ == "__main__":
    key = jax.random.PRNGKey(0)
    kx, kw, kb, kx2, kw2, kb2 = jax.random.split(key, 6)

    # --- main check: small TF-IDF-like input (batch=8 "documents", 256 features) ---
    B, D = 8, 256
    x = jnp.maximum(jax.random.normal(kx, (B, D), dtype=jnp.float32), 0.0)
    bound = 1.0 / jnp.sqrt(jnp.float32(D))
    weight = jax.random.uniform(kw, (1, D), dtype=jnp.float32, minval=-bound, maxval=bound)
    bias = jax.random.uniform(kb, (1,), dtype=jnp.float32, minval=-bound, maxval=bound)

    y = jax.block_until_ready(linear_regressor_forward(x, weight, bias))
    y_ref = (x @ weight.T + bias).reshape(-1)
    assert y.shape == (B,)
    assert jnp.allclose(y, y_ref, atol=1e-5, rtol=1e-4), (y, y_ref)

    # --- also exercise the tiled-D fallback: ragged batch tile + masked D tail ---
    B2, D2 = 13, 300
    x2 = jnp.maximum(jax.random.normal(kx2, (B2, D2), dtype=jnp.float32), 0.0)
    w2 = jax.random.normal(kw2, (1, D2), dtype=jnp.float32) * 0.05
    b2 = jax.random.normal(kb2, (1,), dtype=jnp.float32) * 0.05
    y2 = jax.block_until_ready(linear_regressor_forward(x2, w2, b2, max_td=128))
    y2_ref = (x2 @ w2.T + b2).reshape(-1)
    assert y2.shape == (B2,)
    assert jnp.allclose(y2, y2_ref, atol=1e-5, rtol=1e-4), (y2, y2_ref)

    print("KERNEL_OK")
</pallas_src>

<mosaic_0001>
module attributes {stable_mosaic.version = 11 : i64} {
  func.func @_linear_kernel_full_d(%arg0: i32, %arg1: memref<8x256xf32, #tpu.memory_space<vmem>>, %arg2: memref<1x256xf32, #tpu.memory_space<vmem>>, %arg3: memref<1x1xf32, #tpu.memory_space<smem>>, %arg4: memref<1x8xf32, #tpu.memory_space<vmem>>) attributes {dimension_semantics = [#tpu.dimension_semantics<parallel>], iteration_bounds = array<i64: 1>, scalar_prefetch = 0 : i64, scratch_operands = 0 : i64, tpu.core_type = #tpu.core_type<tc>, window_params = [{transform_indices = @transform_0, window_bounds = array<i64: 8, 256>}, {pipeline_mode = #tpu.pipeline_mode<synchronous>, transform_indices = @transform_1, window_bounds = array<i64: 1, 256>}, {transform_indices = @transform_2, window_bounds = array<i64: 1, 1>}, {transform_indices = @transform_3, window_bounds = array<i64: 1, 8>}]} {
    %c0 = arith.constant 0 : index
    %c0_0 = arith.constant 0 : index
    %0 = vector.load %arg2[%c0, %c0_0] : memref<1x256xf32, #tpu.memory_space<vmem>>, vector<1x256xf32>
    %c0_1 = arith.constant 0 : index
    %c0_2 = arith.constant 0 : index
    %1 = vector.load %arg1[%c0_1, %c0_2] : memref<8x256xf32, #tpu.memory_space<vmem>>, vector<8x256xf32>
    %cst = arith.constant dense<0.000000e+00> : vector<1x8xf32>
    %2 = tpu.matmul %0, %1, %cst {dimension_numbers = #tpu.dot_dimension_numbers<[1], [1], [0], [0], [0, 0, 1, 0], [], []>} : vector<1x256xf32>, vector<8x256xf32>, vector<1x8xf32> -> vector<1x8xf32>
    %c0_3 = arith.constant 0 : index
    %c0_4 = arith.constant 0 : index
    %3 = memref.load %arg3[%c0_3, %c0_4] : memref<1x1xf32, #tpu.memory_space<smem>>
    %4 = vector.broadcast %3 : f32 to vector<1x8xf32>
    %5 = arith.addf %2, %4 : vector<1x8xf32>
    %c0_5 = arith.constant 0 : index
    %c0_6 = arith.constant 0 : index
    %6 = vector.load %arg4[%c0_5, %c0_6] : memref<1x8xf32, #tpu.memory_space<vmem>>, vector<1x8xf32>
    tpu.vector_store %arg4[%c0_5, %c0_6], %5 {strides = array<i32>} : memref<1x8xf32, #tpu.memory_space<vmem>>, vector<1x8xf32>,
    return
  }
  func.func @transform_0(%arg0: i32) -> (i32, i32) {
    %c0_i32 = arith.constant 0 : i32
    %c0_i32_0 = arith.constant 0 : i32
    return %arg0, %c0_i32 : i32, i32
  }
  func.func @transform_1(%arg0: i32) -> (i32, i32) {
    %c0_i32 = arith.constant 0 : i32
    %c0_i32_0 = arith.constant 0 : i32
    %c0_i32_1 = arith.constant 0 : i32
    return %c0_i32, %c0_i32_0 : i32, i32
  }
  func.func @transform_2(%arg0: i32) -> (i32, i32) {
    %c0_i32 = arith.constant 0 : i32
    %c0_i32_0 = arith.constant 0 : i32
    %c0_i32_1 = arith.constant 0 : i32
    return %c0_i32, %c0_i32_0 : i32, i32
  }
  func.func @transform_3(%arg0: i32) -> (i32, i32) {
    %c0_i32 = arith.constant 0 : i32
    %c0_i32_0 = arith.constant 0 : i32
    return %c0_i32, %arg0 : i32, i32
  }
}

</mosaic_0001>

<bundles_post_ra>
// kernel: tpu_custom_call.1
= control target key start
LH: loop header
LB: loop body
LE: loop exit
PB: predicated region body
PF: predicated region fallthrough
CT: control target
= control target key end

     0   :  { %9 = vsyncpa [#allocation4], 0  ;;  %s233_s0 = inlined_call_operand.hbm [shape: f32[8,256], index: 0, kind: input, shape index: {}]   ;;  %s234_s1 = inlined_call_operand.vmem [shape: f32[1,256], index: 1, kind: input, shape index: {}]   ;;  %s235_s2 = inlined_call_operand.<no memory space> [shape: f32[1,1], index: 2, kind: input, shape index: {}]   ;;  %s236_s3 = inlined_call_operand.hbm [shape: f32[1,8], index: 3, kind: output, shape index: {}]  }
   0x1   :  { %10 = vsyncpa [#allocation5], 0  ;;  %s181_s12 = smov [#allocation3]   ;;  %s133_s16 = scalar_lea.hbm %s233_s0, 256 }
   0x2   :  { %s17_s13 = sshll.u32 %s181_s12, 4  ;;  %p134_p0 = scmp.ne.s32.totalorder %s233_s0, %s133_s16  ;;  %s18_s13 = int_to_ptr.vmem [resolvable:$true] %s17_s13 }
   0x3   :  { %p137_p1 = scmp.lt.u32.totalorder %s133_s16, %s233_s0 }
   0x5   :  { %p139_p2 = pnand %p137_p1, %p134_p0 }
   0x7   :  { %142 = shalt.err (!%p139_p2)
}
   0x8   :  { %s143_s21 = scalar_lea.vmem %s18_s13, 256  ;;  %p148_p4 = scmp.lt.s32.totalorder %s18_s13, %s18_s13 }
   0x9   :  { %p144_p3 = scmp.ne.s32.totalorder %s18_s13, %s143_s21  ;;  %p149_p5 = scmp.lt.s32.totalorder %s143_s21, %s143_s21 }
   0xb   :  { %p150_p6 = por %p149_p5, %p148_p4 }
   0xd   :  { %p151_p7 = pnand %p150_p6, %p144_p3 }
   0xf   :  { %154 = shalt.err (!%p151_p7)
}
  0x10   :  { %20 = dma.hbm_to_vmem [thread:$0]  %s233_s0, 256, %s18_s13, [#allocation4]  }
  0x11   :  { %177 = dma.done.wait [#allocation4], 256  }
  0x12   :  { %178 = vsyncadd [#allocation4], 4294967040  ;;  %v34_v0 = vlaneseq  ;;  %v30_v4 = vld [vmem:[#allocation3 + $0x8] sm:$0xff]  ;;  %v29_v5 = vld [vmem:[#allocation3] sm:$0xff]  ;;  %v32_v9 = vstv %s235_s2  ;;  %s182_s27 = smov [#allocation6]   ;;  %vm114_vm0 = vcmask 57344  }
  0x13   :  { %v28_v6 = vld [vmem:[%s234_s1] sm:$0x3]  ;;  %44 = vmatprep.subr.mxu0 %v30_v4  ;;  %s122_s28 = sshll.u32 %s182_s27, 4  ;;  %s123_s28 = int_to_ptr.vmem [resolvable:$true] %s122_s28 }
  0x14   :  { %v35_v1 = vshrl.u32 %v34_v0, 7  ;;  %45 = vmatpush1.xpose.msra.mxu0 %v29_v5  ;;  %s155_s29 = scalar_lea.vmem %s123_s28, 16  ;;  %s159_s1 = scalar_lea.vmem %s123_s28, 32 }
  0x15   :  { %p156_p8 = scmp.ne.s32.totalorder %s123_s28, %s155_s29  ;;  %p160_p9 = scmp.lt.s32.totalorder %s123_s28, %s123_s28 }
  0x16   :  { %v36_v2 = vsub.s32 0, %v35_v1  ;;  %v40_v3 = vsub.s32 1, %v35_v1  ;;  %p161_p10 = scmp.lt.s32.totalorder %s159_s1, %s155_s29 }
  0x18   :  { %v37_v7 = vrot.slane %v28_v6, %v36_v2  ;;  %v41_v8 = vrot.slane %v28_v6, %v40_v3  ;;  %p162_p11 = por %p161_p10, %p160_p9 }
  0x1a   :  { %108 = vmatprep.mubr.f32.mxu0 %v41_v8  ;;  %p163_p12 = pnand %p162_p11, %p156_p8 }
  0x1b   :  { %109 = vmatmul.mubr.f32.vlgmr.msra.gmra.mrb[0].mxu0 %v37_v7 }
  0xee   :  { %v110_v10 = vpop.f32.mrb[0].mxu0 }
  0xef   :  { %v111_v11 = vadd.f32 %v110_v10, %v32_v9  ;;  %v112_v12 = vpop.f32.mrb[1].mxu0 }
  0xf1   :  { %115 = vst.msk [vmem:[#allocation6] sm:$0x1] %vm114_vm0, %v111_v11 }
  0xf2   :  { %166 = shalt.err (!%p163_p12)
}
  0xf3   :  { %s167_s2 = scalar_lea.hbm %s236_s3, 16 }
  0xf4   :  { %p168_p13 = scmp.ne.s32.totalorder %s236_s3, %s167_s2  ;;  %p171_p0 = scmp.lt.u32.totalorder %s167_s2, %s236_s3 }
  0xf6   :  { %p173_p1 = pnand %p171_p0, %p168_p13 }
  0xf8   :  { %176 = shalt.err (!%p173_p1)
}
  0xf9   :  { %125 = dma.vmem_to_hbm [thread:$0]  %s123_s28, 16, %s236_s3, [#allocation5]  }
  0xfa   :  { %179 = dma.done.wait [#allocation5], 16  }
  0xfb   :  { %180 = vsyncadd [#allocation5], 4294967280 }
  0xfc   :  { %129 = vsyncpa [#allocation4], 1 }
  0xfd   :  { %130 = vsyncpa [#allocation5], 1 }

</bundles_post_ra>
